<compile_context>
chip_gen: v6e
topology: v6e:2x2x1
jax: 0.10.0
libtpu: 0.0.40
codegen_flags: <defaults>
</compile_context>

<pallas_src>
import jax
import jax.numpy as jnp
from jax.experimental import pallas as pl
from jax.experimental.pallas import tpu as pltpu

_FEAT_PAD = 8  # feature dim 5 zero-padded to 8 (sublane multiple); pad weights are zero.


def _mlp_kernel(xT_ref, w1_ref, b1_ref, w2_ref, b2_ref, w3_ref, b3_ref, o_ref):
    xT = xT_ref[...]                                                    # (8, TN)
    # fc1 + relu : (16, 8) @ (8, TN) -> (16, TN)
    h1 = jnp.dot(w1_ref[...], xT, preferred_element_type=jnp.float32)
    h1 = jnp.maximum(h1 + b1_ref[...], 0.0)
    # fc2 + relu : (16, 16) @ (16, TN) -> (16, TN)
    h2 = jnp.dot(w2_ref[...], h1, preferred_element_type=jnp.float32)
    h2 = jnp.maximum(h2 + b2_ref[...], 0.0)
    # fc3 + sigmoid (out_features = 1): VPU multiply + sublane reduce keeps MXU free.
    z = jnp.sum(w3_ref[...] * h2, axis=0, keepdims=True) + b3_ref[...]  # (1, TN)
    o_ref[...] = jax.nn.sigmoid(z)


def _round_up(a, m):
    return ((a + m - 1) // m) * m


def flappy_bird_mlp(x, w1, b1, w2, b2, w3, b3, *, tile=8192):
    """Forward pass.  x: (B, 5) f32.  Weights in PyTorch layout: w (out, in), b (out,).
    Returns (B, 1) f32 = sigmoid(fc3(relu(fc2(relu(fc1(x))))))."""
    assert tile % 128 == 0, "lane tile must be a multiple of 128"
    B = x.shape[0]
    tn = min(tile, _round_up(B, 128))   # lane-axis batch tile (multiple of 128)
    Bp = _round_up(B, tn)               # padded batch so the grid divides evenly
    grid = (Bp // tn,)

    # Layout plumbing: batch on lanes, zero-padded features on sublanes.
    x_pad = jnp.zeros((Bp, _FEAT_PAD), jnp.float32).at[:B, :5].set(x.astype(jnp.float32))
    xT = x_pad.T                                                       # (8, Bp)
    w1p = jnp.zeros((16, _FEAT_PAD), jnp.float32).at[:, :5].set(w1)    # (16, 8)
    b1c = b1.reshape(16, 1)
    b2c = b2.reshape(16, 1)
    w3c = w3.reshape(16, 1)                                            # (1,16) -> column
    b3c = b3.reshape(1, 1)

    const2 = lambda i: (0, 0)  # weights/biases: same block every step -> VMEM-resident
    out = pl.pallas_call(
        _mlp_kernel,
        out_shape=jax.ShapeDtypeStruct((1, Bp), jnp.float32),
        grid=grid,
        in_specs=[
            pl.BlockSpec((_FEAT_PAD, tn), lambda i: (0, i)),   # xT, batch-tiled on lanes
            pl.BlockSpec((16, _FEAT_PAD), const2),             # fc1 W
            pl.BlockSpec((16, 1), const2),                     # fc1 b
            pl.BlockSpec((16, 16), const2),                    # fc2 W
            pl.BlockSpec((16, 1), const2),                     # fc2 b
            pl.BlockSpec((16, 1), const2),                     # fc3 W (column)
            pl.BlockSpec((1, 1), const2),                      # fc3 b
        ],
        out_specs=pl.BlockSpec((1, tn), lambda i: (0, i)),     # lane-dense output slab
        compiler_params=pltpu.CompilerParams(
            dimension_semantics=("parallel",)),
    )(xT, w1p, b1c, w2, b2c, w3c, b3c)

    return out[0, :B].reshape(B, 1)


def init_params(key):
    """Deterministic init mimicking nn.Linear (uniform +/-1/sqrt(fan_in)), PyTorch layout."""
    ks = jax.random.split(key, 6)

    def linear(kw, kb, fan_in, fan_out):
        bound = 1.0 / jnp.sqrt(float(fan_in))
        w = jax.random.uniform(kw, (fan_out, fan_in), jnp.float32, -bound, bound)
        b = jax.random.uniform(kb, (fan_out,), jnp.float32, -bound, bound)
        return w, b

    w1, b1 = linear(ks[0], ks[1], 5, 16)
    w2, b2 = linear(ks[2], ks[3], 16, 16)
    w3, b3 = linear(ks[4], ks[5], 16, 1)
    return w1, b1, w2, b2, w3, b3


def reference(x, w1, b1, w2, b2, w3, b3):
    h1 = jax.nn.relu(x @ w1.T + b1)
    h2 = jax.nn.relu(h1 @ w2.T + b2)
    return jax.nn.sigmoid(h2 @ w3.T + b3)


if __name__ == "__main__":
    key = jax.random.PRNGKey(0)
    kx, kp = jax.random.split(key)
    params = init_params(kp)

    # Small batch (matches the module's typical per-step usage).
    B = 8
    x = jax.random.normal(kx, (B, 5), jnp.float32)
    out = jax.block_until_ready(flappy_bird_mlp(x, *params))
    ref = reference(x, *params)
    assert out.shape == (B, 1)
    assert jnp.allclose(out, ref, atol=1e-5, rtol=1e-5), "mismatch vs JAX reference (B=8)"

    # Non-multiple-of-128 batch with a small tile: exercises the multi-step pipelined
    # grid, batch padding/unpadding, and VMEM-resident weights across iterations.
    B2 = 300
    x2 = jax.random.normal(jax.random.fold_in(kx, 1), (B2, 5), jnp.float32)
    out2 = jax.block_until_ready(flappy_bird_mlp(x2, *params, tile=128))
    ref2 = reference(x2, *params)
    assert out2.shape == (B2, 1)
    assert jnp.allclose(out2, ref2, atol=1e-5, rtol=1e-5), "mismatch vs JAX reference (B=300)"

    print("KERNEL_OK")
</pallas_src>

<mosaic_0001>
module attributes {stable_mosaic.version = 11 : i64} {
  func.func @_mlp_kernel(%arg0: i32, %arg1: memref<8x128xf32, #tpu.memory_space<vmem>>, %arg2: memref<16x8xf32, #tpu.memory_space<vmem>>, %arg3: memref<16x1xf32, #tpu.memory_space<vmem>>, %arg4: memref<16x16xf32, #tpu.memory_space<vmem>>, %arg5: memref<16x1xf32, #tpu.memory_space<vmem>>, %arg6: memref<16x1xf32, #tpu.memory_space<vmem>>, %arg7: memref<1x1xf32, #tpu.memory_space<vmem>>, %arg8: memref<1x128xf32, #tpu.memory_space<vmem>>) attributes {dimension_semantics = [#tpu.dimension_semantics<parallel>], iteration_bounds = array<i64: 1>, scalar_prefetch = 0 : i64, scratch_operands = 0 : i64, tpu.core_type = #tpu.core_type<tc>, window_params = [{transform_indices = @transform_0, window_bounds = array<i64: 8, 128>}, {pipeline_mode = #tpu.pipeline_mode<synchronous>, transform_indices = @transform_1, window_bounds = array<i64: 16, 8>}, {pipeline_mode = #tpu.pipeline_mode<synchronous>, transform_indices = @transform_2, window_bounds = array<i64: 16, 1>}, {pipeline_mode = #tpu.pipeline_mode<synchronous>, transform_indices = @transform_3, window_bounds = array<i64: 16, 16>}, {pipeline_mode = #tpu.pipeline_mode<synchronous>, transform_indices = @transform_4, window_bounds = array<i64: 16, 1>}, {pipeline_mode = #tpu.pipeline_mode<synchronous>, transform_indices = @transform_5, window_bounds = array<i64: 16, 1>}, {pipeline_mode = #tpu.pipeline_mode<synchronous>, transform_indices = @transform_6, window_bounds = array<i64: 1, 1>}, {transform_indices = @transform_7, window_bounds = array<i64: 1, 128>}]} {
    %c0 = arith.constant 0 : index
    %c0_0 = arith.constant 0 : index
    %0 = vector.load %arg1[%c0, %c0_0] : memref<8x128xf32, #tpu.memory_space<vmem>>, vector<8x128xf32>
    %c0_1 = arith.constant 0 : index
    %c0_2 = arith.constant 0 : index
    %1 = vector.load %arg2[%c0_1, %c0_2] : memref<16x8xf32, #tpu.memory_space<vmem>>, vector<16x8xf32>
    %cst = arith.constant dense<0.000000e+00> : vector<16x128xf32>
    %2 = tpu.matmul %1, %0, %cst {dimension_numbers = #tpu.dot_dimension_numbers<[1], [0], [0], [1], [0, 0, 1, 1], [], []>} : vector<16x8xf32>, vector<8x128xf32>, vector<16x128xf32> -> vector<16x128xf32>
    %c0_3 = arith.constant 0 : index
    %c0_4 = arith.constant 0 : index
    %3 = vector.load %arg3[%c0_3, %c0_4] : memref<16x1xf32, #tpu.memory_space<vmem>>, vector<16x1xf32>
    %4 = vector.broadcast %3 : vector<16x1xf32> to vector<16x128xf32>
    %5 = arith.addf %2, %4 : vector<16x128xf32>
    %cst_5 = arith.constant 0.000000e+00 : f32
    %6 = vector.broadcast %cst_5 : f32 to vector<16x128xf32>
    %7 = arith.maximumf %5, %6 : vector<16x128xf32>
    %c0_6 = arith.constant 0 : index
    %c0_7 = arith.constant 0 : index
    %8 = vector.load %arg4[%c0_6, %c0_7] : memref<16x16xf32, #tpu.memory_space<vmem>>, vector<16x16xf32>
    %cst_8 = arith.constant dense<0.000000e+00> : vector<16x128xf32>
    %9 = tpu.matmul %8, %7, %cst_8 {dimension_numbers = #tpu.dot_dimension_numbers<[1], [0], [0], [1], [0, 0, 1, 1], [], []>} : vector<16x16xf32>, vector<16x128xf32>, vector<16x128xf32> -> vector<16x128xf32>
    %c0_9 = arith.constant 0 : index
    %c0_10 = arith.constant 0 : index
    %10 = vector.load %arg5[%c0_9, %c0_10] : memref<16x1xf32, #tpu.memory_space<vmem>>, vector<16x1xf32>
    %11 = vector.broadcast %10 : vector<16x1xf32> to vector<16x128xf32>
    %12 = arith.addf %9, %11 : vector<16x128xf32>
    %cst_11 = arith.constant 0.000000e+00 : f32
    %13 = vector.broadcast %cst_11 : f32 to vector<16x128xf32>
    %14 = arith.maximumf %12, %13 : vector<16x128xf32>
    %c0_12 = arith.constant 0 : index
    %c0_13 = arith.constant 0 : index
    %15 = vector.load %arg6[%c0_12, %c0_13] : memref<16x1xf32, #tpu.memory_space<vmem>>, vector<16x1xf32>
    %16 = vector.broadcast %15 : vector<16x1xf32> to vector<16x128xf32>
    %17 = arith.mulf %16, %14 : vector<16x128xf32>
    %cst_14 = arith.constant dense<0.000000e+00> : vector<128xf32>
    %18 = vector.multi_reduction <add>, %17, %cst_14 [0] : vector<16x128xf32> to vector<128xf32>
    %19 = vector.shape_cast %18 : vector<128xf32> to vector<1x128xf32>
    %c0_15 = arith.constant 0 : index
    %c0_16 = arith.constant 0 : index
    %20 = vector.load %arg7[%c0_15, %c0_16] : memref<1x1xf32, #tpu.memory_space<vmem>>, vector<1x1xf32>
    %21 = vector.broadcast %20 : vector<1x1xf32> to vector<1x128xf32>
    %22 = arith.addf %19, %21 : vector<1x128xf32>
    %23 = arith.negf %22 : vector<1x128xf32>
    %24 = math.exp %23 : vector<1x128xf32>
    %cst_17 = arith.constant 1.000000e+00 : f32
    %25 = vector.broadcast %cst_17 : f32 to vector<1x128xf32>
    %26 = arith.addf %25, %24 : vector<1x128xf32>
    %27 = arith.divf %25, %26 : vector<1x128xf32>
    %c0_18 = arith.constant 0 : index
    %c0_19 = arith.constant 0 : index
    %28 = vector.load %arg8[%c0_18, %c0_19] : memref<1x128xf32, #tpu.memory_space<vmem>>, vector<1x128xf32>
    tpu.vector_store %arg8[%c0_18, %c0_19], %27 {strides = array<i32>} : memref<1x128xf32, #tpu.memory_space<vmem>>, vector<1x128xf32>,
    return
  }
  func.func @transform_0(%arg0: i32) -> (i32, i32) {
    %c0_i32 = arith.constant 0 : i32
    %c0_i32_0 = arith.constant 0 : i32
    return %c0_i32, %arg0 : i32, i32
  }
  func.func @transform_1(%arg0: i32) -> (i32, i32) {
    %c0_i32 = arith.constant 0 : i32
    %c0_i32_0 = arith.constant 0 : i32
    %c0_i32_1 = arith.constant 0 : i32
    return %c0_i32, %c0_i32_0 : i32, i32
  }
  func.func @transform_2(%arg0: i32) -> (i32, i32) {
    %c0_i32 = arith.constant 0 : i32
    %c0_i32_0 = arith.constant 0 : i32
    %c0_i32_1 = arith.constant 0 : i32
    return %c0_i32, %c0_i32_0 : i32, i32
  }
  func.func @transform_3(%arg0: i32) -> (i32, i32) {
    %c0_i32 = arith.constant 0 : i32
    %c0_i32_0 = arith.constant 0 : i32
    %c0_i32_1 = arith.constant 0 : i32
    return %c0_i32, %c0_i32_0 : i32, i32
  }
  func.func @transform_4(%arg0: i32) -> (i32, i32) {
    %c0_i32 = arith.constant 0 : i32
    %c0_i32_0 = arith.constant 0 : i32
    %c0_i32_1 = arith.constant 0 : i32
    return %c0_i32, %c0_i32_0 : i32, i32
  }
  func.func @transform_5(%arg0: i32) -> (i32, i32) {
    %c0_i32 = arith.constant 0 : i32
    %c0_i32_0 = arith.constant 0 : i32
    %c0_i32_1 = arith.constant 0 : i32
    return %c0_i32, %c0_i32_0 : i32, i32
  }
  func.func @transform_6(%arg0: i32) -> (i32, i32) {
    %c0_i32 = arith.constant 0 : i32
    %c0_i32_0 = arith.constant 0 : i32
    %c0_i32_1 = arith.constant 0 : i32
    return %c0_i32, %c0_i32_0 : i32, i32
  }
  func.func @transform_7(%arg0: i32) -> (i32, i32) {
    %c0_i32 = arith.constant 0 : i32
    %c0_i32_0 = arith.constant 0 : i32
    return %c0_i32, %arg0 : i32, i32
  }
}

</mosaic_0001>

<bundles_post_ra>
// kernel: tpu_custom_call.1
= control target key start
LH: loop header
LB: loop body
LE: loop exit
PB: predicated region body
PF: predicated region fallthrough
CT: control target
= control target key end

     0   :  { %s416_s0 = inlined_call_operand.vmem [shape: f32[8,128], index: 0, kind: input, shape index: {}]   ;;  %s417_s1 = inlined_call_operand.vmem [shape: f32[16,8], index: 1, kind: input, shape index: {}]   ;;  %s418_s2 = inlined_call_operand.vmem [shape: f32[16,1], index: 2, kind: input, shape index: {}]   ;;  %s419_s3 = inlined_call_operand.vmem [shape: f32[16,16], index: 3, kind: input, shape index: {}]   ;;  %s420_s4 = inlined_call_operand.vmem [shape: f32[16,1], index: 4, kind: input, shape index: {}]   ;;  %s421_s5 = inlined_call_operand.vmem [shape: f32[16,1], index: 5, kind: input, shape index: {}]   ;;  %s422_s6 = inlined_call_operand.<no memory space> [shape: f32[1,1], index: 6, kind: input, shape index: {}]   ;;  %s423_s7 = inlined_call_operand.hbm [shape: f32[1,128], index: 7, kind: output, shape index: {}]  }
   0x1   :  { %v12_v0 = vstv %s422_s6 }
   0x2   :  { %13 = vst [vmem:[#allocation2] sm:$0x1] %v12_v0 }
   0x3   :  { %v29_v1 = vld [vmem:[%s416_s0] sm:$0xff]  ;;  %vm44_vm0 = vcmask 64512   ;;  %v31_v3 = vld [vmem:[%s417_s1 + $0x8] sm:$0xff]  ;;  %v333_v5 = vmov 0  }
   0x4   :  { %v30_v2 = vld [vmem:[%s417_s1] sm:$0xff]  ;;  %291 = vmatprep.subr.mxu0 %v29_v1  ;;  %v33_v4 = vld [vmem:[%s418_s2 + $0x8] sm:$0xff]  ;;  %305 = vset.pattern.permute.xlu0 %v333_v5 }
   0x5   :  { %293 = vmatprep.mubr.msk.f32.mxu0 %vm44_vm0, %v30_v2  ;;  %292 = vmatpush3.msra.mxu0 %v29_v1 }
   0x6   :  { %14 = vsyncpa [#allocation4], 0  ;;  %294 = vmatmul.mubr.msk.f32.vlgmr.msra.gmra.mxu0 %vm44_vm0, %v31_v3  ;;  %41 = vperm.xlu0 %305, %v33_v4   ;;  %v32_v6 = vld [vmem:[%s418_s2] sm:$0xff]  ;;  %vm142_vm1 = vcmask 130048   ;;  %v131_v11 = vld [vmem:[%s420_s4 + $0x8] sm:$0xff]  ;;  %v253_v34 = vlaneseq }
   0x7   :  { %306 = vset.pattern.permute.xlu1 %v333_v5  ;;  %v226_v7 = vld [vmem:[%s421_s5] sm:$0xff]  ;;  %v227_v12 = vld [vmem:[%s421_s5 + $0x8] sm:$0xff] }
   0x8   :  { %v128_v9 = vld [vmem:[%s419_s3] sm:$0xff]  ;;  %v129_v21 = vld [vmem:[%s419_s3 + $0x8] sm:$0xff]  ;;  %v254_v37 = vshrl.u32 %v253_v34, 7  ;;  %s334_s3 = smov [#allocation3]  }
   0x9   :  { %v247_v8 = vld [vmem:[#allocation2] sm:$0x1]  ;;  %300 = vmatprep.mubr.msk.f32.mxu1 %vm142_vm1, %v128_v9 }
   0xa   :  { %36 = vperm.xlu0 %305, %v32_v6   ;;  %v130_v10 = vld [vmem:[%s420_s4] sm:$0xff]  ;;  %v255_v40 = vsub.s32 0, %v254_v37  ;;  %s271_s4 = sshll.u32 %s334_s3, 4  ;;  %s272_s4 = int_to_ptr.vmem [resolvable:$true] %s271_s4 }
   0xb   :  { %134 = vperm.xlu1 %306, %v130_v10   ;;  %s311_s5 = scalar_lea.vmem %s272_s4, 16  ;;  %s315_s21 = scalar_lea.vmem %s272_s4, 32 }
   0xc   :  { %p312_p0 = scmp.ne.s32.totalorder %s272_s4, %s311_s5  ;;  %p316_p1 = scmp.lt.s32.totalorder %s272_s4, %s272_s4 }
   0xd   :  { %p317_p2 = scmp.lt.s32.totalorder %s315_s21, %s311_s5 }
   0xe   :  { %230 = vperm.xlu0 %305, %v226_v7  }
   0xf   :  { %139 = vperm.xlu1 %306, %v131_v11   ;;  %p318_p3 = por %p317_p2, %p316_p1 }
  0x11   :  { %p319_p4 = pnand %p318_p3, %p312_p0 }
  0x12   :  { %250 = vperm.xlu0 %305, %v247_v8  }
  0x13   :  { %235 = vperm.xlu1 %306, %v227_v12  }
  0x81   :  { %v42_v13 = vpop.permute.xlu0 %41 }
  0x85   :  { %v37_v16 = vpop.permute.xlu0 %36 }
  0x86   :  { %v135_v22 = vpop.permute.xlu1 %134 }
  0x89   :  { %v231_v30 = vpop.permute.xlu0 %230 }
  0x8a   :  { %v140_v23 = vpop.permute.xlu1 %139 }
  0x8d   :  { %v251_v42 = vpop.permute.xlu0 %250 }
  0x8e   :  { %v236_v31 = vpop.permute.xlu1 %235  ;;  %v256_v44 = vrot.slane %v251_v42, %v255_v40 }
  0xc6   :  { %v295_v14 = vpop.f32.mrf.mxu0 }
  0xc7   :  { %v123_v15 = vadd.f32 %v295_v14, %v42_v13 }
  0xc8   :  { %v117_v17 = vpop.f32.mrf.mxu0 }
  0xc9   :  { %v127_v18 = vmax.f32 %v123_v15, 0.0  ;;  %v118_v19 = vadd.f32 %v117_v17, %v37_v16 }
  0xcb   :  { %v126_v20 = vmax.f32 %v118_v19, 0.0  ;;  %296 = vmatprep.subr.mxu1 %v127_v18 }
  0xcc   :  { %297 = vmatpush3.msra.mxu1 %v127_v18 }
  0xcd   :  { %298 = vmatprep.subr.mxu1 %v126_v20 }
  0xce   :  { %299 = vmatpush3.msra.mxu1 %v126_v20 }
  0xcf   :  { %301 = vmatmul.mubr.msk.f32.vlgmr.msra.gmra.mxu1 %vm142_vm1, %v129_v21 }
 0x18f   :  { %v302_v24 = vpop.f32.mrf.mxu1 }
 0x190   :  { %v221_v25 = vadd.f32 %v302_v24, %v140_v23 }
 0x191   :  { %v215_v26 = vpop.f32.mrf.mxu1 }
 0x192   :  { %v225_v27 = vmax.f32 %v221_v25, 0.0  ;;  %v216_v28 = vadd.f32 %v215_v26, %v135_v22 }
 0x194   :  { %v224_v29 = vmax.f32 %v216_v28, 0.0  ;;  %v239_v32 = vmul.f32 %v236_v31, %v225_v27 }
 0x196   :  { %v238_v33 = vmul.f32 %v231_v30, %v224_v29 }
 0x198   :  { %v240_v35 = vadd.f32 %v239_v32, %v238_v33 }
 0x19a   :  { %v241_v36 = vrot.slane %v240_v35, 4 }
 0x19c   :  { %v242_v38 = vadd.f32 %v241_v36, %v240_v35 }
 0x19e   :  { %v243_v39 = vrot.slane %v242_v38, 2 }
 0x1a0   :  { %v244_v41 = vadd.f32 %v243_v39, %v242_v38 }
 0x1a2   :  { %v245_v43 = vrot.slane %v244_v41, 1 }
 0x1a4   :  { %v246_v45 = vadd.f32 %v245_v43, %v244_v41 }
 0x1a6   :  { %v257_v46 = vadd.f32 %v256_v44, %v246_v45 }
 0x1a8   :  { %v283_v47 = vmul.f32 -1.442695, %v257_v46 }
 0x1aa   :  { %307 = vpow2.f32 %v283_v47 }
 0x1b7   :  { %v308_v48 = vpop.eup %307 }
 0x1b8   :  { %v261_v49 = vadd.f32 1.0, %v308_v48 }
 0x1ba   :  { %309 = vrcp.f32 %v261_v49 }
 0x1c7   :  { %v310_v50 = vpop.eup %309 }
 0x1c8   :  { %264 = vst [vmem:[#allocation3] sm:$0x1] %v310_v50 }
 0x1c9   :  { %322 = shalt.err (!%p319_p4)
}
 0x1ca   :  { %274 = dma.vmem_to_hbm [thread:$0]  %s272_s4, 16, %s423_s7, [#allocation4]  }
 0x1cb   :  { %331 = dma.done.wait [#allocation4], 16  }
 0x1cc   :  { %332 = vsyncadd [#allocation4], 4294967280 }
 0x1cd   :  { %278 = vsyncpa [#allocation4], 1 }

</bundles_post_ra>
